<compile_context>
chip_gen: v7x
topology: tpu7x:2x2x1
jax: 0.10.0
libtpu: 0.0.40
codegen_flags: <defaults>
</compile_context>

<pallas_src>
import functools
import math

import jax
import jax.numpy as jnp
from jax import lax
from jax.experimental import pallas as pl
from jax.experimental.pallas import tpu as pltpu


def _sketch0_kernel(k_ref, v_ref, qs0_ref, mask_ref,
                    out0_ref, prob_ref, vsum_ref, *, dn2):
    k = k_ref[0]          # (H, N, P)   raw keys
    v = v_ref[0]          # (H, N, P)   raw values
    qs0 = qs0_ref[0]      # (H, F, P)   raw gathered queries (sketch rows, unmasked)
    msk = mask_ref[0]     # (1, N)      padding mask (0/1), lane-dense

    h = k.shape[0]

    # logits[h, f, n] = dn^2 * mask[n] * <k[h, n, :], qs0[h, f, :]>
    #   == (k * mask * p^-.25) @ (q_gathered * p^-.25)^T of the reference.
    prod = lax.dot_general(qs0, k, (((2,), (2,)), ((0,), (0,))),
                           preferred_element_type=jnp.float32)          # (H, F, N)
    logits = prod * (dn2 * msk)

    # Column-normalized exp; the per-(h,f) max shift cancels exactly in dinv,
    # and the rs0 factor of the reference cancels too (constant over n).
    mmax = jnp.max(logits, axis=-1, keepdims=True)                      # (H, F, 1)
    ats0 = jnp.exp(logits - mmax) * msk                                 # (H, F, N)
    col_sum = jnp.sum(ats0, axis=-1, keepdims=True)                     # (H, F, 1)
    dinv = ats0 * pl.reciprocal(col_sum, approx=True)                   # (H, F, N) == Dinv_S0TA

    # out0[h, f, p] = sum_n dinv[h, f, n] * v[h, n, p]
    out0_ref[0] = lax.dot_general(dinv.astype(v.dtype), v,
                                  (((2,), (1,)), ((0,), (0,))),
                                  preferred_element_type=jnp.float32)   # (H, F, P)

    # prob[h, n] = sqrt( sum_f dinv[h,f,n]^2 * sum_p v[h,n,p]^2 ), lane-dense (H,1,N)
    dsq = jnp.sum(dinv * dinv, axis=1, keepdims=True)                   # (H, 1, N)
    vf = v.astype(jnp.float32)
    vt = jnp.swapaxes(vf, 1, 2)                                         # (H, P, N)
    vsq = jnp.sum(vt * vt, axis=1, keepdims=True)                       # (H, 1, N)
    prob_ref[0] = jnp.sqrt(dsq * vsq)

    # Masked value column-sum for kernel 2 via the MXU:
    # vsum[h, p] = sum_n mask[n] * v[h, n, p]
    mrow = jnp.broadcast_to(msk, (h, 1, msk.shape[-1])).astype(v.dtype)  # (H, 1, N)
    vsum_ref[0] = lax.dot_general(mrow, v, (((2,), (1,)), ((0,), (0,))),
                                  preferred_element_type=jnp.float32)    # (H, 1, P)


def _main_kernel(q_ref, k1_ref, s1tv_ref, vsum_ref, mask_ref, scal_ref,
                 out1_ref, *, dn2):
    q = q_ref[0]            # (H, TN, P)  raw queries (row tile)
    k1 = k1_ref[0]          # (H, M, P)   gathered keys   (M = accumulation * nb_features)
    s1tv = s1tv_ref[0]      # (H, M, P)   gathered values
    vsum = vsum_ref[0]      # (H, 1, P)   masked column-sum of v (from kernel 1)
    msk = mask_ref[0]       # (TN, 1)     padding mask for this row tile
    scal = scal_ref[pl.program_id(0)]     # scalar: non_padding_num[b] - nb_features

    # qK1[h, n, m] = dn^2 * mask[n] * <q[h, n, :], k1[h, m, :]>
    qk1 = lax.dot_general(q, k1, (((2,), (2,)), ((0,), (0,))),
                          preferred_element_type=jnp.float32)           # (H, TN, M)
    logits = qk1 * (dn2 * msk)

    # Row-max shift: every term below scales by exp(-mmax) and cancels in out.
    mmax = jnp.max(logits, axis=-1, keepdims=True)                      # (H, TN, 1)
    as1 = jnp.exp(logits - mmax)                                        # (H, TN, M)
    av1 = lax.dot_general(as1.astype(s1tv.dtype), s1tv,
                          (((2,), (1,)), ((0,), (0,))),
                          preferred_element_type=jnp.float32)           # (H, TN, P)

    a1_sum = jnp.sum(as1, axis=-1, keepdims=True)                       # (H, TN, 1)
    mc = jnp.exp(jnp.mean(logits, axis=-1, keepdims=True) - mmax)       # (H, TN, 1) model_column
    s1tv_sum = jnp.sum(s1tv.astype(jnp.float32), axis=1, keepdims=True)  # (H, 1, P)

    d1 = a1_sum + mc * scal                                             # (H, TN, 1)
    out = (av1 + mc * (vsum - s1tv_sum)) * pl.reciprocal(d1, approx=True)
    out1_ref[0] = out.astype(out1_ref.dtype)


def skein_attention(q, k, v, mask, *, nb_features, accumulation, key, block_n=512):
    b, h, n, p = q.shape
    dn2 = p ** (-0.5)                      # data_normalizer ** 2, folded into the kernels
    mask_f = mask.astype(jnp.float32)
    non_padding_num = jnp.sum(mask_f, axis=-1)                          # (B,)

    # Host clamp mirrors the PyTorch reference's `.item()`; keeps nbf static for tiling.
    nbf = min(nb_features, int(jnp.min(non_padding_num)) - 1)
    m = accumulation * nbf

    key0, key1 = jax.random.split(key)

    # ---- uniform sketching S0 (sampling glue; rs0 cancels in the normalization) ----
    s_rand = jax.random.uniform(key0, (1, nbf), dtype=jnp.float32)
    S0_flat = jnp.floor(non_padding_num[:, None] * s_rand).astype(jnp.int32)   # (B, F)
    QS0 = jnp.take_along_axis(q, S0_flat[:, None, :, None], axis=2)            # (B, H, F, P)

    mask_row = mask_f[:, None, :]          # (B, 1, N)  lane-dense, for kernel 1
    mask_col = mask_f[:, :, None]          # (B, N, 1)  for kernel 2 row scaling

    bmap4 = lambda bi: (bi, 0, 0, 0)
    bmap3 = lambda bi: (bi, 0, 0)

    out0, prob, v_sum = pl.pallas_call(
        functools.partial(_sketch0_kernel, dn2=dn2),
        out_shape=(jax.ShapeDtypeStruct((b, h, nbf, p), jnp.float32),
                   jax.ShapeDtypeStruct((b, h, 1, n), jnp.float32),
                   jax.ShapeDtypeStruct((b, h, 1, p), jnp.float32)),
        grid=(b,),
        in_specs=[pl.BlockSpec((1, h, n, p), bmap4),        # k  (raw)
                  pl.BlockSpec((1, h, n, p), bmap4),        # v  (raw)
                  pl.BlockSpec((1, h, nbf, p), bmap4),      # QS0 (raw gathered q)
                  pl.BlockSpec((1, 1, n), bmap3)],          # mask (lane-dense)
        out_specs=(pl.BlockSpec((1, h, nbf, p), bmap4),     # out0
                   pl.BlockSpec((1, h, 1, n), bmap4),       # prob (lane-dense)
                   pl.BlockSpec((1, h, 1, p), bmap4)),      # masked v column-sum
        compiler_params=pltpu.CompilerParams(dimension_semantics=("parallel",)),
    )(k, v, QS0, mask_row)

    prob_av = prob[:, :, 0, :]                               # (B, H, N)

    # ---- importance sketching: multinomial w/o replacement via Gumbel top-k --------
    # TODO(synk): torch.multinomial has no in-kernel equivalent; sampling stays in JAX.
    w = prob_av / jnp.sum(prob_av, axis=-1, keepdims=True)
    logw = jnp.where(w > 0, jnp.log(w), -jnp.inf)
    gumbel = jax.random.gumbel(key1, (b, h, n), dtype=jnp.float32)
    _, S1_flat = lax.top_k(logw + gumbel, m)                 # (B, H, M)

    # Gathered rows are always non-padded, so no extra masking is needed on them.
    K1 = jnp.take_along_axis(k, S1_flat[..., None], axis=2)   # (B, H, M, P)
    S1TV = jnp.take_along_axis(v, S1_flat[..., None], axis=2)  # (B, H, M, P)

    scal = (non_padding_num - float(nbf)).astype(jnp.float32)  # (B,) -> SMEM

    # Row-tile over N (independent rows once v_sum is hoisted) for VMEM headroom.
    tn = min(n, block_n)
    if n % tn != 0:
        tn = n
    nt = n // tn

    out1 = pl.pallas_call(
        functools.partial(_main_kernel, dn2=dn2),
        out_shape=jax.ShapeDtypeStruct((b, h, n, p), jnp.float32),
        grid=(b, nt),
        in_specs=[pl.BlockSpec((1, h, tn, p), lambda bi, ti: (bi, 0, ti, 0)),   # q
                  pl.BlockSpec((1, h, m, p), lambda bi, ti: (bi, 0, 0, 0)),     # K1
                  pl.BlockSpec((1, h, m, p), lambda bi, ti: (bi, 0, 0, 0)),     # S1TV
                  pl.BlockSpec((1, h, 1, p), lambda bi, ti: (bi, 0, 0, 0)),     # v_sum
                  pl.BlockSpec((1, tn, 1), lambda bi, ti: (bi, ti, 0)),         # mask col
                  pl.BlockSpec(memory_space=pltpu.MemorySpace.SMEM)],           # scal (B,)
        out_specs=pl.BlockSpec((1, h, tn, p), lambda bi, ti: (bi, 0, ti, 0)),
        compiler_params=pltpu.CompilerParams(
            dimension_semantics=("parallel", "parallel")),
    )(q, K1, S1TV, v_sum, mask_col, scal)

    # Rows sampled by S0 get the exact sketch-0 result (scatter stays in plain JAX).
    out1_t = jnp.swapaxes(out1, 1, 2)                        # (B, N, H, P)
    out0_t = jnp.swapaxes(out0, 1, 2)                        # (B, F, H, P)
    out1_t = out1_t.at[jnp.arange(b)[:, None], S0_flat].set(out0_t)
    return jnp.swapaxes(out1_t, 1, 2)                        # (B, H, N, P)


if __name__ == "__main__":
    # config: max_seq_len=128, head_dim=32, nb_features=8, accumulation=4,
    #         sketched_kernel='kernel_RS_SM', no_projection=False
    B, H, N, P = 2, 2, 128, 32
    NB_FEATURES = 8
    ACCUMULATION = 4

    root = jax.random.PRNGKey(0)
    kq, kk, kv, ksamp = jax.random.split(root, 4)
    q = jax.random.normal(kq, (B, H, N, P), dtype=jnp.float32)
    k = jax.random.normal(kk, (B, H, N, P), dtype=jnp.float32)
    v = jax.random.normal(kv, (B, H, N, P), dtype=jnp.float32)
    # batch 0: no padding; batch 1: last 16 positions padded
    mask = jnp.stack([
        jnp.ones((N,), jnp.float32),
        jnp.concatenate([jnp.ones((N - 16,), jnp.float32),
                         jnp.zeros((16,), jnp.float32)]),
    ], axis=0)

    out = skein_attention(q, k, v, mask,
                          nb_features=NB_FEATURES,
                          accumulation=ACCUMULATION,
                          key=ksamp)
    jax.block_until_ready(out)
    assert out.shape == (B, H, N, P)
    assert bool(jnp.all(jnp.isfinite(out)))
    print("KERNEL_OK")
</pallas_src>

<mosaic_0001>
module attributes {stable_mosaic.version = 11 : i64} {
  func.func @_sketch0_kernel(%arg0: i32, %arg1: memref<1x2x128x32xf32, #tpu.memory_space<vmem>>, %arg2: memref<1x2x128x32xf32, #tpu.memory_space<vmem>>, %arg3: memref<1x2x8x32xf32, #tpu.memory_space<vmem>>, %arg4: memref<1x1x128xf32, #tpu.memory_space<vmem>>, %arg5: memref<1x2x8x32xf32, #tpu.memory_space<vmem>>, %arg6: memref<1x2x1x128xf32, #tpu.memory_space<vmem>>, %arg7: memref<1x2x1x32xf32, #tpu.memory_space<vmem>>) attributes {dimension_semantics = [#tpu.dimension_semantics<parallel>], iteration_bounds = array<i64: 2>, scalar_prefetch = 0 : i64, scratch_operands = 0 : i64, tpu.core_type = #tpu.core_type<tc>, window_params = [{transform_indices = @transform_0, window_bounds = array<i64: 1, 2, 128, 32>}, {transform_indices = @transform_1, window_bounds = array<i64: 1, 2, 128, 32>}, {transform_indices = @transform_2, window_bounds = array<i64: 1, 2, 8, 32>}, {transform_indices = @transform_3, window_bounds = array<i64: 1, 1, 128>}, {transform_indices = @transform_4, window_bounds = array<i64: 1, 2, 8, 32>}, {transform_indices = @transform_5, window_bounds = array<i64: 1, 2, 1, 128>}, {transform_indices = @transform_6, window_bounds = array<i64: 1, 2, 1, 32>}]} {
    %c0 = arith.constant 0 : index
    %c0_0 = arith.constant 0 : index
    %c0_1 = arith.constant 0 : index
    %c0_2 = arith.constant 0 : index
    %0 = vector.load %arg1[%c0, %c0_0, %c0_1, %c0_2] : memref<1x2x128x32xf32, #tpu.memory_space<vmem>>, vector<1x2x128x32xf32>
    %1 = vector.shape_cast %0 : vector<1x2x128x32xf32> to vector<2x128x32xf32>
    %c0_3 = arith.constant 0 : index
    %c0_4 = arith.constant 0 : index
    %c0_5 = arith.constant 0 : index
    %c0_6 = arith.constant 0 : index
    %2 = vector.load %arg2[%c0_3, %c0_4, %c0_5, %c0_6] : memref<1x2x128x32xf32, #tpu.memory_space<vmem>>, vector<1x2x128x32xf32>
    %3 = vector.shape_cast %2 : vector<1x2x128x32xf32> to vector<2x128x32xf32>
    %c0_7 = arith.constant 0 : index
    %c0_8 = arith.constant 0 : index
    %c0_9 = arith.constant 0 : index
    %c0_10 = arith.constant 0 : index
    %4 = vector.load %arg3[%c0_7, %c0_8, %c0_9, %c0_10] : memref<1x2x8x32xf32, #tpu.memory_space<vmem>>, vector<1x2x8x32xf32>
    %5 = vector.shape_cast %4 : vector<1x2x8x32xf32> to vector<2x8x32xf32>
    %c0_11 = arith.constant 0 : index
    %c0_12 = arith.constant 0 : index
    %c0_13 = arith.constant 0 : index
    %6 = vector.load %arg4[%c0_11, %c0_12, %c0_13] : memref<1x1x128xf32, #tpu.memory_space<vmem>>, vector<1x1x128xf32>
    %7 = vector.shape_cast %6 : vector<1x1x128xf32> to vector<1x128xf32>
    %cst = arith.constant dense<0.000000e+00> : vector<2x8x128xf32>
    %8 = tpu.matmul %5, %1, %cst {dimension_numbers = #tpu.dot_dimension_numbers<[2], [2], [1], [1], [0, 0, 0, 1, 1, 1], [0], [0]>} : vector<2x8x32xf32>, vector<2x128x32xf32>, vector<2x8x128xf32> -> vector<2x8x128xf32>
    %cst_14 = arith.constant 0.176776692 : f32
    %9 = vector.broadcast %cst_14 : f32 to vector<1x128xf32>
    %10 = arith.mulf %9, %7 : vector<1x128xf32>
    %11 = vector.shape_cast %10 : vector<1x128xf32> to vector<1x1x128xf32>
    %12 = vector.broadcast %11 : vector<1x1x128xf32> to vector<2x8x128xf32>
    %13 = arith.mulf %8, %12 : vector<2x8x128xf32>
    %cst_15 = arith.constant dense<0xFF800000> : vector<2x8xf32>
    %14 = vector.multi_reduction <maximumf>, %13, %cst_15 [2] : vector<2x8x128xf32> to vector<2x8xf32>
    %15 = vector.shape_cast %14 : vector<2x8xf32> to vector<2x8x1xf32>
    %16 = vector.broadcast %15 : vector<2x8x1xf32> to vector<2x8x128xf32>
    %17 = arith.subf %13, %16 : vector<2x8x128xf32>
    %18 = math.exp %17 : vector<2x8x128xf32>
    %19 = vector.shape_cast %7 : vector<1x128xf32> to vector<1x1x128xf32>
    %20 = vector.broadcast %19 : vector<1x1x128xf32> to vector<2x8x128xf32>
    %21 = arith.mulf %18, %20 : vector<2x8x128xf32>
    %cst_16 = arith.constant dense<0.000000e+00> : vector<2x8xf32>
    %22 = vector.multi_reduction <add>, %21, %cst_16 [2] : vector<2x8x128xf32> to vector<2x8xf32>
    %23 = vector.shape_cast %22 : vector<2x8xf32> to vector<2x8x1xf32>
    %24 = tpu.reciprocal %23 {approx = true} : vector<2x8x1xf32> -> vector<2x8x1xf32>
    %25 = vector.broadcast %24 : vector<2x8x1xf32> to vector<2x8x128xf32>
    %26 = arith.mulf %21, %25 : vector<2x8x128xf32>
    %cst_17 = arith.constant dense<0.000000e+00> : vector<2x8x32xf32>
    %27 = tpu.matmul %26, %3, %cst_17 {dimension_numbers = #tpu.dot_dimension_numbers<[2], [1], [1], [2], [0, 0, 0, 1, 1, 2], [0], [0]>} : vector<2x8x128xf32>, vector<2x128x32xf32>, vector<2x8x32xf32> -> vector<2x8x32xf32>
    %c0_18 = arith.constant 0 : index
    %c0_19 = arith.constant 0 : index
    %c0_20 = arith.constant 0 : index
    %c0_21 = arith.constant 0 : index
    %28 = vector.load %arg5[%c0_18, %c0_19, %c0_20, %c0_21] : memref<1x2x8x32xf32, #tpu.memory_space<vmem>>, vector<1x2x8x32xf32>
    %29 = vector.shape_cast %28 : vector<1x2x8x32xf32> to vector<2x8x32xf32>
    %30 = vector.shape_cast %27 : vector<2x8x32xf32> to vector<1x2x8x32xf32>
    tpu.vector_store %arg5[%c0_18, %c0_19, %c0_20, %c0_21], %30 {strides = array<i32>} : memref<1x2x8x32xf32, #tpu.memory_space<vmem>>, vector<1x2x8x32xf32>,
    %31 = arith.mulf %26, %26 : vector<2x8x128xf32>
    %cst_22 = arith.constant dense<0.000000e+00> : vector<2x128xf32>
    %32 = vector.multi_reduction <add>, %31, %cst_22 [1] : vector<2x8x128xf32> to vector<2x128xf32>
    %33 = vector.shape_cast %32 : vector<2x128xf32> to vector<2x1x128xf32>
    %34 = tpu.transpose %3, [0, 2, 1] : vector<2x128x32xf32> -> vector<2x32x128xf32>
    %35 = arith.mulf %34, %34 : vector<2x32x128xf32>
    %cst_23 = arith.constant dense<0.000000e+00> : vector<2x128xf32>
    %36 = vector.multi_reduction <add>, %35, %cst_23 [1] : vector<2x32x128xf32> to vector<2x128xf32>
    %37 = vector.shape_cast %36 : vector<2x128xf32> to vector<2x1x128xf32>
    %38 = arith.mulf %33, %37 : vector<2x1x128xf32>
    %39 = math.sqrt %38 : vector<2x1x128xf32>
    %c0_24 = arith.constant 0 : index
    %c0_25 = arith.constant 0 : index
    %c0_26 = arith.constant 0 : index
    %c0_27 = arith.constant 0 : index
    %40 = vector.load %arg6[%c0_24, %c0_25, %c0_26, %c0_27] : memref<1x2x1x128xf32, #tpu.memory_space<vmem>>, vector<1x2x1x128xf32>
    %41 = vector.shape_cast %40 : vector<1x2x1x128xf32> to vector<2x1x128xf32>
    %42 = vector.shape_cast %39 : vector<2x1x128xf32> to vector<1x2x1x128xf32>
    tpu.vector_store %arg6[%c0_24, %c0_25, %c0_26, %c0_27], %42 {strides = array<i32>} : memref<1x2x1x128xf32, #tpu.memory_space<vmem>>, vector<1x2x1x128xf32>,
    %43 = vector.shape_cast %7 : vector<1x128xf32> to vector<1x1x128xf32>
    %44 = vector.broadcast %43 : vector<1x1x128xf32> to vector<2x1x128xf32>
    %cst_28 = arith.constant dense<0.000000e+00> : vector<2x1x32xf32>
    %45 = tpu.matmul %44, %3, %cst_28 {dimension_numbers = #tpu.dot_dimension_numbers<[2], [1], [1], [2], [0, 0, 0, 1, 1, 2], [0], [0]>} : vector<2x1x128xf32>, vector<2x128x32xf32>, vector<2x1x32xf32> -> vector<2x1x32xf32>
    %c0_29 = arith.constant 0 : index
    %c0_30 = arith.constant 0 : index
    %c0_31 = arith.constant 0 : index
    %c0_32 = arith.constant 0 : index
    %46 = vector.load %arg7[%c0_29, %c0_30, %c0_31, %c0_32] : memref<1x2x1x32xf32, #tpu.memory_space<vmem>>, vector<1x2x1x32xf32>
    %47 = vector.shape_cast %46 : vector<1x2x1x32xf32> to vector<2x1x32xf32>
    %48 = vector.shape_cast %45 : vector<2x1x32xf32> to vector<1x2x1x32xf32>
    tpu.vector_store %arg7[%c0_29, %c0_30, %c0_31, %c0_32], %48 {strides = array<i32>} : memref<1x2x1x32xf32, #tpu.memory_space<vmem>>, vector<1x2x1x32xf32>,
    return
  }
  func.func @transform_0(%arg0: i32) -> (i32, i32, i32, i32) {
    %c0_i32 = arith.constant 0 : i32
    %c0_i32_0 = arith.constant 0 : i32
    %c0_i32_1 = arith.constant 0 : i32
    %c0_i32_2 = arith.constant 0 : i32
    return %arg0, %c0_i32, %c0_i32_0, %c0_i32_1 : i32, i32, i32, i32
  }
  func.func @transform_1(%arg0: i32) -> (i32, i32, i32, i32) {
    %c0_i32 = arith.constant 0 : i32
    %c0_i32_0 = arith.constant 0 : i32
    %c0_i32_1 = arith.constant 0 : i32
    %c0_i32_2 = arith.constant 0 : i32
    return %arg0, %c0_i32, %c0_i32_0, %c0_i32_1 : i32, i32, i32, i32
  }
  func.func @transform_2(%arg0: i32) -> (i32, i32, i32, i32) {
    %c0_i32 = arith.constant 0 : i32
    %c0_i32_0 = arith.constant 0 : i32
    %c0_i32_1 = arith.constant 0 : i32
    %c0_i32_2 = arith.constant 0 : i32
    return %arg0, %c0_i32, %c0_i32_0, %c0_i32_1 : i32, i32, i32, i32
  }
  func.func @transform_3(%arg0: i32) -> (i32, i32, i32) {
    %c0_i32 = arith.constant 0 : i32
    %c0_i32_0 = arith.constant 0 : i32
    %c0_i32_1 = arith.constant 0 : i32
    return %arg0, %c0_i32, %c0_i32_0 : i32, i32, i32
  }
  func.func @transform_4(%arg0: i32) -> (i32, i32, i32, i32) {
    %c0_i32 = arith.constant 0 : i32
    %c0_i32_0 = arith.constant 0 : i32
    %c0_i32_1 = arith.constant 0 : i32
    %c0_i32_2 = arith.constant 0 : i32
    return %arg0, %c0_i32, %c0_i32_0, %c0_i32_1 : i32, i32, i32, i32
  }
  func.func @transform_5(%arg0: i32) -> (i32, i32, i32, i32) {
    %c0_i32 = arith.constant 0 : i32
    %c0_i32_0 = arith.constant 0 : i32
    %c0_i32_1 = arith.constant 0 : i32
    %c0_i32_2 = arith.constant 0 : i32
    return %arg0, %c0_i32, %c0_i32_0, %c0_i32_1 : i32, i32, i32, i32
  }
  func.func @transform_6(%arg0: i32) -> (i32, i32, i32, i32) {
    %c0_i32 = arith.constant 0 : i32
    %c0_i32_0 = arith.constant 0 : i32
    %c0_i32_1 = arith.constant 0 : i32
    %c0_i32_2 = arith.constant 0 : i32
    return %arg0, %c0_i32, %c0_i32_0, %c0_i32_1 : i32, i32, i32, i32
  }
}

</mosaic_0001>

<bundles_post_ra>
// kernel: tpu_custom_call.1
= control target key start
LH: loop header
LB: loop body
LE: loop exit
PB: predicated region body
PF: predicated region fallthrough
CT: control target
= control target key end

     0   :  { %12 = vsyncpa [#allocation3], 0  ;;  %s2540_s0 = inlined_call_operand.vmem [shape: f32[2,2,128,32], index: 0, kind: input, shape index: {}]   ;;  %s2541_s1 = inlined_call_operand.vmem [shape: f32[2,2,128,32], index: 1, kind: input, shape index: {}]   ;;  %s2542_s2 = inlined_call_operand.vmem [shape: f32[2,2,8,32], index: 2, kind: input, shape index: {}]   ;;  %s2543_s3 = inlined_call_operand.vmem [shape: f32[2,1,128], index: 3, kind: input, shape index: {}]   ;;  %s2544_s4 = inlined_call_operand.hbm [shape: f32[2,2,8,32], index: 4, kind: output, shape index: {0}]   ;;  %s2545_s5 = inlined_call_operand.hbm [shape: f32[2,2,1,128], index: 5, kind: output, shape index: {1}]   ;;  %s2546_s6 = inlined_call_operand.hbm [shape: f32[2,2,1,32], index: 6, kind: output, shape index: {2}]  }
   0x1   :  { %14 = vsyncpa [#allocation3 + $0x1], 0 }
   0x2   :  { %15 = vsyncpa [#allocation5], 0 }
   0x3   :  { %17 = vsyncpa [#allocation5 + $0x1], 0  ;;  %s2059_s21 = smov 0   ;;  %s2061_s22 = smov 0  }
   0x4   :  { %s2063_s23 = smov 0   ;;  %s2065_s24 = smov 0  }
   0x5 LB: > { %s2080_s25 = sadd.s32 4294967295, %s2012_s24   ;;  %s2547_s26 = sadd.s32 4294967294, %s2012_s24   ;;  %s2012_s24 = sphi %s2065_s24, %s2560_s24   ;;  %s2008_s23 = sphi %s2063_s23, %s2559_s23   ;;  %s2004_s22 = sphi %s2061_s22, %s2558_s22   ;;  %s2000_s21 = sphi %s2059_s21, %s2557_s21  }
   0x6   : > { %s2084_s27 = sadd.s32 1, %s2012_s24   ;;  %s134_s28 = sadd.s32 1, %s2008_s23 }
   0x7   : > { %s131_s29 = ssub.s32 %s2012_s24, %s2084_s27  ;;  %p144_p0 = scmp.ne.s32.totalorder %s2008_s23, %s2004_s22 }
   0x8   : > { %p132_p1 = scmp.eq.s32.totalorder %s131_s29, 0  ;;  %p145_p2 = scmp.eq.s32.totalorder %s2080_s25, 1 }
   0x9   : > { %p150_p3 = scmp.ne.s32.totalorder %s2004_s22, %s2000_s21  ;;  %p151_p4 = scmp.eq.s32.totalorder %s2547_s26, 1 }
   0xa   : > { %s2097_s30 = scalar_select %p132_p1, %s2008_s23, %s134_s28  }
   0xb   : > { %p2099_p5 = por %p145_p2, %p144_p0  ;;  %p2103_p6 = por %p151_p4, %p150_p3 }
   0xc   : > { %p1289_p7 = scmp.ge.s32.totalorder %s2012_s24, 1  ;;  %p251_p8 = scmp.lt.s32.totalorder %s2012_s24, 3 }
   0xe   : > { %p252_p9 = pnand %p1289_p7, %p251_p8 }
   0xf   : > { %p304_p10 = scmp.lt.s32.totalorder (!%p252_p9), %s2080_s25, 1  ;;  %v2014_v0 = vmov (!%p252_p9), 0.0|0.0   ;;  %vm389_vm0 = vcmask (!%p252_p9), 261120   ;;  %vm2015_vm1 = vmmov (!%p252_p9), 0   ;;  %v2016_v1 = vmov (!%p252_p9), 0.0   ;;  %s1348_s15 = sshll.u32 (!%p252_p9), %s2080_s25, 5 }
  0x10   : > { %255 = sbr.rel (%p252_p9) target bundleno = 884 (0x374), region = 36  ;;  %1662 = vmatprep.subr.bf16.mxu0 (!%p252_p9), %v2014_v0  ;;  %1694 = vmatprep.subr.bf16.mxu1 (!%p252_p9), %v2014_v0  ;;  %vm2129_vm2 = vmpackc.low (!%p252_p9), %vm389_vm0, %vm389_vm0  ;;  %v634_v53 = vlaneseq (!%p252_p9)  ;;  %s2421_s18 = scalar_lea.hbm (!%p252_p9), %s2545_s5, %s1348_s15 }
  0x11   : > { %1484 = vmatprep.mubr.msk.f32.mxu0 (!%p252_p9), %vm2015_vm1, %v2016_v1  ;;  %1519 = vmatprep.mubr.msk.f32.mxu1 (!%p252_p9), %vm2015_vm1, %v2016_v1  ;;  %s2017_s28 = smov (!%p252_p9), [#allocation4]  }
  0x12   : > { %v2227_v54 = vshrl.u32 (!%p252_p9), %v634_v53, 7  ;;  %s1894_s29 = sshll.u32 (!%p252_p9), %s2017_s28, 4  ;;  %s1895_s29 = int_to_ptr.vmem [resolvable:$false] %s1894_s29 }
  0x14   : > { %v636_v57 = vsub.s32 (!%p252_p9), 0, %v2227_v54 }
  0x17   : > { %s2113_s9 = scalar_select %p304_p10, %s2080_s25, 1 }
  0x19   : > { %s1344_s10 = sshll.u32 %s2113_s9, 8  ;;  %s1346_s14 = sshll.u32 %s2113_s9, 4 }
  0x1a   : > { %s2125_s13 = scalar_lea.vmem %s2540_s0, %s1344_s10  ;;  %s318_s17 = scalar_lea.vmem %s2542_s2, %s1346_s14 }
  0x1b   : > { %v322_v3 = vld [vmem:[%s2125_s13] sm:$0xff]  ;;  %v323_v4 = vld [vmem:[%s2125_s13 + $0x8] sm:$0xff]  ;;  %v324_v9 = vld [vmem:[%s2125_s13 + $0x10] sm:$0xff]  ;;  %s321_s20 = scalar_lea.vmem %s2543_s3, %s2113_s9  ;;  %s2246_s11 = scalar_lea.vmem %s2541_s1, %s1344_s10 }
  0x1c   : > { %v338_v5 = vld [vmem:[%s2125_s13 + $0x80] sm:$0xff]  ;;  %v1663_v6 = vpack.c.bf16 %v323_v4, %v322_v3  ;;  %v339_v7 = vld [vmem:[%s2125_s13 + $0x88] sm:$0xff]  ;;  %v325_v10 = vld [vmem:[%s2125_s13 + $0x18] sm:$0xff]  ;;  %s2392_s9 = sand.u32 1, %s2004_s22   ;;  %s1079_s14 = sand.u32 1, %s2080_s25  }
  0x1d   : > { %v1695_v8 = vpack.c.bf16 %v339_v7, %v338_v5  ;;  %v340_v11 = vld [vmem:[%s2125_s13 + $0x90] sm:$0xff]  ;;  %v341_v12 = vld [vmem:[%s2125_s13 + $0x98] sm:$0xff]  ;;  %v1667_v13 = vpack.c.bf16 %v325_v10, %v324_v9  ;;  %v326_v15 = vld [vmem:[%s2125_s13 + $0x20] sm:$0xff]  ;;  %s1291_s10 = sshll.u32 %s2392_s9, 1  ;;  %s2423_s19 = scalar_lea.sflag [#allocation5], %s1079_s14 }
  0x1e   : > { %1665 = vmatpush3.bf16.xpose.msk.msra.mxu0 %vm2129_vm2, %v1663_v6  ;;  %v1699_v14 = vpack.c.bf16 %v341_v12, %v340_v11  ;;  %v327_v16 = vld [vmem:[%s2125_s13 + $0x28] sm:$0xff]  ;;  %v342_v17 = vld [vmem:[%s2125_s13 + $0xa0] sm:$0xff]  ;;  %v328_v21 = vld [vmem:[%s2125_s13 + $0x30] sm:$0xff]  ;;  %s2404_s12 = scalar_lea.vmem [#allocation4], %s1291_s10 }
  0x1f   : > { %1697 = vmatpush3.bf16.xpose.msk.msra.mxu1 %vm2129_vm2, %v1695_v8  ;;  %1666 = vmatprep.subr.bf16.mxu0 %v2014_v0  ;;  %v343_v18 = vld [vmem:[%s2125_s13 + $0xa8] sm:$0xff]  ;;  %v1671_v19 = vpack.c.bf16 %v327_v16, %v326_v15  ;;  %v329_v22 = vld [vmem:[%s2125_s13 + $0x38] sm:$0xff]  ;;  %v344_v23 = vld [vmem:[%s2125_s13 + $0xb0] sm:$0xff] }
  0x20   : > { %1698 = vmatprep.subr.bf16.mxu1 %v2014_v0  ;;  %v1703_v20 = vpack.c.bf16 %v343_v18, %v342_v17  ;;  %v345_v24 = vld [vmem:[%s2125_s13 + $0xb8] sm:$0xff]  ;;  %v1675_v25 = vpack.c.bf16 %v329_v22, %v328_v21  ;;  %v330_v27 = vld [vmem:[%s2125_s13 + $0x40] sm:$0xff]  ;;  %v331_v28 = vld [vmem:[%s2125_s13 + $0x48] sm:$0xff] }
  0x21   : > { %v1707_v26 = vpack.c.bf16 %v345_v24, %v344_v23  ;;  %v346_v29 = vld [vmem:[%s2125_s13 + $0xc0] sm:$0xff]  ;;  %v347_v30 = vld [vmem:[%s2125_s13 + $0xc8] sm:$0xff]  ;;  %v1679_v31 = vpack.c.bf16 %v331_v28, %v330_v27  ;;  %v332_v33 = vld [vmem:[%s2125_s13 + $0x50] sm:$0xff] }
  0x22   : > { %v1711_v32 = vpack.c.bf16 %v347_v30, %v346_v29  ;;  %v333_v34 = vld [vmem:[%s2125_s13 + $0x58] sm:$0xff]  ;;  %v348_v35 = vld [vmem:[%s2125_s13 + $0xd0] sm:$0xff]  ;;  %v334_v39 = vld [vmem:[%s2125_s13 + $0x60] sm:$0xff] }
  0x23   : > { %v349_v36 = vld [vmem:[%s2125_s13 + $0xd8] sm:$0xff]  ;;  %v1683_v37 = vpack.c.bf16 %v333_v34, %v332_v33  ;;  %v335_v40 = vld [vmem:[%s2125_s13 + $0x68] sm:$0xff]  ;;  %v350_v41 = vld [vmem:[%s2125_s13 + $0xe0] sm:$0xff] }
  0x24   : > { %v1715_v38 = vpack.c.bf16 %v349_v36, %v348_v35  ;;  %v351_v42 = vld [vmem:[%s2125_s13 + $0xe8] sm:$0xff]  ;;  %v1687_v43 = vpack.c.bf16 %v335_v40, %v334_v39  ;;  %v336_v45 = vld [vmem:[%s2125_s13 + $0x70] sm:$0xff]  ;;  %v337_v46 = vld [vmem:[%s2125_s13 + $0x78] sm:$0xff] }
  0x25   : > { %v1719_v44 = vpack.c.bf16 %v351_v42, %v350_v41  ;;  %v352_v47 = vld [vmem:[%s2125_s13 + $0xf0] sm:$0xff]  ;;  %v353_v48 = vld [vmem:[%s2125_s13 + $0xf8] sm:$0xff]  ;;  %v1691_v49 = vpack.c.bf16 %v337_v46, %v336_v45  ;;  %v386_v51 = vld [vmem:[%s318_s17] sm:$0xff]  ;;  %s1114_s13 = sshll.u32 %s2404_s12, 4  ;;  %s2412_s13 = int_to_ptr.vmem [resolvable:$true] %s1114_s13 }
  0x26   : > { %1669 = vmatpush3.bf16.xpose.msk.msra.mxu0 %vm2129_vm2, %v1667_v13  ;;  %v1723_v50 = vpack.c.bf16 %v353_v48, %v352_v47  ;;  %v387_v52 = vld [vmem:[%s318_s17 + $0x8] sm:$0xff]  ;;  %v2229_v55 = vld [vmem:[%s321_s20] sm:$0x1]  ;;  %v356_v6 = vld [vmem:[%s2246_s11 + $0x10] sm:$0xff]  ;;  %s1890_s20 = scalar_lea.vmem %s2412_s13, 32  ;;  %p1897_p0 = scmp.lt.s32.totalorder %s2412_s13, %s1895_s29 }
  0x27   : > { %1701 = vmatpush3.bf16.xpose.msk.msra.mxu1 %vm2129_vm2, %v1699_v14  ;;  %1670 = vmatprep.subr.bf16.mxu0 %v2014_v0  ;;  %v632_v56 = vmul.f32 0.17677669, %v2229_v55  ;;  %v354_v3 = vld [vmem:[%s2246_s11] sm:$0xff]  ;;  %v355_v4 = vld [vmem:[%s2246_s11 + $0x8] sm:$0xff]  ;;  %v357_v7 = vld [vmem:[%s2246_s11 + $0x18] sm:$0xff]  ;;  %p1891_p11 = scmp.ne.s32.totalorder %s2412_s13, %s1890_s20 }
  0x28   : > { %1702 = vmatprep.subr.bf16.mxu1 %v2014_v0  ;;  %v2250_v5 = vpack.c.bf16 %v355_v4, %v354_v3  ;;  %v2254_v8 = vpack.c.bf16 %v357_v7, %v356_v6  ;;  %v2258_v9 = vld [vmem:[%s2246_s11 + $0x80] sm:$0xff]  ;;  %v2261_v10 = vld [vmem:[%s2246_s11 + $0x88] sm:$0xff]  ;;  %v360_v15 = vld [vmem:[%s2246_s11 + $0x30] sm:$0xff] }
  0x29   : > { %v637_v58 = vrot.slane %v632_v56, %v636_v57  ;;  %v2266_v11 = vpack.c.bf16 %v2261_v10, %v2258_v9  ;;  %v358_v12 = vld [vmem:[%s2246_s11 + $0x20] sm:$0xff]  ;;  %v359_v13 = vld [vmem:[%s2246_s11 + $0x28] sm:$0xff]  ;;  %v361_v16 = vld [vmem:[%s2246_s11 + $0x38] sm:$0xff]  ;;  %p1892_p12 = pnand %p1891_p11, %p2099_p5 }
  0x2a   : > { %v2270_v14 = vpack.c.bf16 %v359_v13, %v358_v12  ;;  %v2278_v17 = vpack.c.bf16 %v361_v16, %v360_v15  ;;  %v362_v18 = vld [vmem:[%s2246_s11 + $0x40] sm:$0xff]  ;;  %v364_v21 = vld [vmem:[%s2246_s11 + $0x50] sm:$0xff]  ;;  %v365_v22 = vld [vmem:[%s2246_s11 + $0x58] sm:$0xff] }
  0x2b   : > { %v2292_v23 = vpack.c.bf16 %v365_v22, %v364_v21  ;;  %v366_v24 = vld [vmem:[%s2246_s11 + $0x60] sm:$0xff]  ;;  %v2302_v27 = vld [vmem:[%s2246_s11 + $0x98] sm:$0xff]  ;;  %v368_v30 = vld [vmem:[%s2246_s11 + $0x70] sm:$0xff]  ;;  %p1893_p13 = pneg %p1892_p12 }
  0x2c   : > { %v375_v33 = vld [vmem:[%s2246_s11 + $0xa8] sm:$0xff]  ;;  %v376_v36 = vld [vmem:[%s2246_s11 + $0xb0] sm:$0xff]  ;;  %v378_v39 = vld [vmem:[%s2246_s11 + $0xc0] sm:$0xff] }
  0x2d   : > { %v379_v40 = vld [vmem:[%s2246_s11 + $0xc8] sm:$0xff]  ;;  %v380_v42 = vld [vmem:[%s2246_s11 + $0xd0] sm:$0xff]  ;;  %v382_v45 = vld [vmem:[%s2246_s11 + $0xe0] sm:$0xff] }
  0x2e   : > { %1673 = vmatpush3.bf16.xpose.msk.msra.mxu0 %vm2129_vm2, %v1671_v19  ;;  %v363_v19 = vld [vmem:[%s2246_s11 + $0x48] sm:$0xff]  ;;  %v2334_v41 = vpack.c.bf16 %v379_v40, %v378_v39 }
  0x2f   : > { %1705 = vmatpush3.bf16.xpose.msk.msra.mxu1 %vm2129_vm2, %v1703_v20  ;;  %1674 = vmatprep.subr.bf16.mxu0 %v2014_v0  ;;  %v2284_v20 = vpack.c.bf16 %v363_v19, %v362_v18  ;;  %v383_v46 = vld [vmem:[%s2246_s11 + $0xe8] sm:$0xff] }
  0x30   : > { %1706 = vmatprep.subr.bf16.mxu1 %v2014_v0  ;;  %v2346_v47 = vpack.c.bf16 %v383_v46, %v382_v45 }
  0x36   : > { %1677 = vmatpush3.bf16.xpose.msk.msra.mxu0 %vm2129_vm2, %v1675_v25  ;;  %v2298_v25 = vld [vmem:[%s2246_s11 + $0x90] sm:$0xff] }
  0x37   : > { %1709 = vmatpush3.bf16.xpose.msk.msra.mxu1 %vm2129_vm2, %v1707_v26  ;;  %1678 = vmatprep.subr.bf16.mxu0 %v2014_v0  ;;  %v367_v26 = vld [vmem:[%s2246_s11 + $0x68] sm:$0xff]  ;;  %v2308_v29 = vpack.c.bf16 %v2302_v27, %v2298_v25 }
  0x38   : > { %1710 = vmatprep.subr.bf16.mxu1 %v2014_v0  ;;  %v2304_v28 = vpack.c.bf16 %v367_v26, %v366_v24 }
  0x3e   : > { %1681 = vmatpush3.bf16.xpose.msk.msra.mxu0 %vm2129_vm2, %v1679_v31  ;;  %v374_v31 = vld [vmem:[%s2246_s11 + $0xa0] sm:$0xff] }
  0x3f   : > { %1713 = vmatpush3.bf16.xpose.msk.msra.mxu1 %vm2129_vm2, %v1711_v32  ;;  %1682 = vmatprep.subr.bf16.mxu0 %v2014_v0  ;;  %v369_v32 = vld [vmem:[%s2246_s11 + $0x78] sm:$0xff]  ;;  %v2320_v35 = vpack.c.bf16 %v375_v33, %v374_v31 }
  0x40   : > { %1714 = vmatprep.subr.bf16.mxu1 %v2014_v0  ;;  %v2318_v34 = vpack.c.bf16 %v369_v32, %v368_v30 }
  0x46   : > { %1685 = vmatpush3.bf16.xpose.msk.msra.mxu0 %vm2129_vm2, %v1683_v37  ;;  %v377_v37 = vld [vmem:[%s2246_s11 + $0xb8] sm:$0xff] }
  0x47   : > { %1717 = vmatpush3.bf16.xpose.msk.msra.mxu1 %vm2129_vm2, %v1715_v38  ;;  %1686 = vmatprep.subr.bf16.mxu0 %v2014_v0  ;;  %v2328_v38 = vpack.c.bf16 %v377_v37, %v376_v36 }
  0x48   : > { %1718 = vmatprep.subr.bf16.mxu1 %v2014_v0 }
  0x4e   : > { %1689 = vmatpush3.bf16.xpose.msk.msra.mxu0 %vm2129_vm2, %v1687_v43  ;;  %v381_v43 = vld [vmem:[%s2246_s11 + $0xd8] sm:$0xff] }
  0x4f   : > { %1721 = vmatpush3.bf16.xpose.msk.msra.mxu1 %vm2129_vm2, %v1719_v44  ;;  %1690 = vmatprep.subr.bf16.mxu0 %v2014_v0  ;;  %v2340_v44 = vpack.c.bf16 %v381_v43, %v380_v42 }
  0x50   : > { %1722 = vmatprep.subr.bf16.mxu1 %v2014_v0 }
  0x56   : > { %1693 = vmatpush3.bf16.xpose.msk.msra.mxu0 %vm2129_vm2, %v1691_v49 }
  0x57   : > { %1725 = vmatpush3.bf16.xpose.msk.msra.mxu1 %vm2129_vm2, %v1723_v50  ;;  %1726 = vmatprep.subr.bf16.mxu0 %v2014_v0  ;;  %v384_v50 = vld [vmem:[%s2246_s11 + $0xf0] sm:$0xff] }
  0x58   : > { %1750 = vmatprep.subr.bf16.mxu1 %v2014_v0 }
  0x5d   : > { %1485 = vmatmul.mubr.msk.f32.vlgmr.msra.gmra.mrb[0].mxu0 %vm389_vm0, %v386_v51  ;;  %v385_v51 = vld [vmem:[%s2246_s11 + $0xf8] sm:$0xff]  ;;  %s1896_s11 = scalar_lea.vmem %s1895_s29, 64 }
  0x5e   : > { %1520 = vmatmul.mubr.msk.f32.vlgmr.msra.gmra.mrb[0].mxu1 %vm389_vm0, %v387_v52  ;;  %1554 = vmatprep.mubr.msk.f32.mxu0 %vm2015_vm1, %v2016_v1  ;;  %v2353_v52 = vpack.c.bf16 %v385_v51, %v384_v50  ;;  %p1898_p1 = scmp.lt.s32.totalorder %s1896_s11, %s1890_s20 }
  0x5f   : > { %1589 = vmatprep.mubr.msk.f32.mxu1 %vm2015_vm1, %v2016_v1  ;;  %1728 = vmatpush3.bf16.msra.mxu0 %v2250_v5 }
  0x60   : > { %1729 = vmatprep.subr.bf16.mxu0 %v2014_v0  ;;  %1752 = vmatpush3.bf16.msra.mxu1 %v2266_v11  ;;  %p1899_p2 = por %p1898_p1, %p1897_p0 }
  0x61   : > { %1753 = vmatprep.subr.bf16.mxu1 %v2014_v0 }
  0x62   : > { %p1900_p3 = pnand %p1899_p2, %p1893_p13 }
  0x63   : > { %1731 = vmatpush3.bf16.msra.mxu0 %v2254_v8 }
  0x64   : > { %1732 = vmatprep.subr.bf16.mxu0 %v2014_v0  ;;  %1755 = vmatpush3.bf16.msra.mxu1 %v2308_v29 }
  0x65   : > { %1756 = vmatprep.subr.bf16.mxu1 %v2014_v0 }
  0x67   : > { %1734 = vmatpush3.bf16.msra.mxu0 %v2270_v14 }
  0x68   : > { %1735 = vmatprep.subr.bf16.mxu0 %v2014_v0  ;;  %1758 = vmatpush3.bf16.msra.mxu1 %v2320_v35 }
  0x69   : > { %1759 = vmatprep.subr.bf16.mxu1 %v2014_v0 }
  0x6b   : > { %1737 = vmatpush3.bf16.msra.mxu0 %v2278_v17 }
  0x6c   : > { %1738 = vmatprep.subr.bf16.mxu0 %v2014_v0  ;;  %1761 = vmatpush3.bf16.msra.mxu1 %v2328_v38 }
  0x6d   : > { %1762 = vmatprep.subr.bf16.mxu1 %v2014_v0 }
  0x6f   : > { %1740 = vmatpush3.bf16.msra.mxu0 %v2284_v20 }
  0x70   : > { %1741 = vmatprep.subr.bf16.mxu0 %v2014_v0  ;;  %1764 = vmatpush3.bf16.msra.mxu1 %v2334_v41 }
  0x71   : > { %1765 = vmatprep.subr.bf16.mxu1 %v2014_v0 }
  0x73   : > { %1743 = vmatpush3.bf16.msra.mxu0 %v2292_v23 }
  0x74   : > { %1744 = vmatprep.subr.bf16.mxu0 %v2014_v0  ;;  %1767 = vmatpush3.bf16.msra.mxu1 %v2340_v44 }
  0x75   : > { %1768 = vmatprep.subr.bf16.mxu1 %v2014_v0 }
  0x77   : > { %1746 = vmatpush3.bf16.msra.mxu0 %v2304_v28 }
  0x78   : > { %1747 = vmatprep.subr.bf16.mxu0 %v2014_v0  ;;  %1770 = vmatpush3.bf16.msra.mxu1 %v2346_v47 }
  0x79   : > { %1771 = vmatprep.subr.bf16.mxu1 %v2014_v0 }
  0x7b   : > { %1749 = vmatpush3.bf16.msra.mxu0 %v2318_v34 }
  0x7c   : > { %1774 = vmatprep.subr.bf16.mxu0 %v2014_v0  ;;  %1773 = vmatpush3.bf16.msra.mxu1 %v2353_v52 }
  0x7d   : > { %1798 = vmatprep.subr.bf16.mxu1 %v2014_v0 }
 0x130   : > { %v507_v59 = vpop.f32.mrb[0].mxu0 }
 0x131   : > { %v2235_v60 = vmul.f32 %v637_v58, %v507_v59  ;;  %v1486_v61 = vpop.f32.mrb[1].mxu0  ;;  %v628_v62 = vpop.f32.mrb[0].mxu1 }
 0x132   : > { %v1521_v63 = vpop.f32.mrb[1].mxu1  ;;  %v2237_v2 = vmul.f32 %v637_v58, %v628_v62  ;;  %v655_v61 = vrot.slane %v2229_v55, %v636_v57 }
 0x133   : > { %641 = vmax.xlane.f32.xlu0 %v2235_v60 }
 0x137   : > { %643 = vmax.xlane.f32.xlu0 %v2237_v2 }
 0x164   : > { %823 = vxpose.xlu0.b32.start [1/16] (narrow) %v354_v3, 32 }
 0x168   : > { %824 = vxpose.xlu0.b32.cont [2/16] (narrow) %v355_v4, 32 }
 0x16c   : > { %825 = vxpose.xlu0.b32.cont [3/16] (narrow) %v356_v6, 32 }
 0x170   : > { %826 = vxpose.xlu0.b32.cont [4/16] (narrow) %v357_v7, 32 }
 0x174   : > { %827 = vxpose.xlu0.b32.cont [5/16] (narrow) %v358_v12, 32 }
 0x178   : > { %828 = vxpose.xlu0.b32.cont [6/16] (narrow) %v359_v13, 32 }
 0x17c   : > { %829 = vxpose.xlu0.b32.cont [7/16] (narrow) %v360_v15, 32 }
 0x180   : > { %830 = vxpose.xlu0.b32.cont [8/16] (narrow) %v361_v16, 32 }
 0x184   : > { %831 = vxpose.xlu0.b32.cont [9/16] (narrow) %v362_v18, 32 }
 0x188   : > { %832 = vxpose.xlu0.b32.cont [10/16] (narrow) %v363_v19, 32 }
 0x18c   : > { %833 = vxpose.xlu0.b32.cont [11/16] (narrow) %v364_v21, 32 }
 0x190   : > { %834 = vxpose.xlu0.b32.cont [12/16] (narrow) %v365_v22, 32 }
 0x194   : > { %835 = vxpose.xlu0.b32.cont [13/16] (narrow) %v366_v24, 32 }
 0x198   : > { %836 = vxpose.xlu0.b32.cont [14/16] (narrow) %v367_v26, 32 }
 0x19c   : > { %837 = vxpose.xlu0.b32.cont [15/16] (narrow) %v368_v30, 32 }
 0x1a0   : > { %838 = vxpose.xlu0.b32.end [16/16] (narrow) %v369_v32, 32 }
 0x1c0   : > { %v642_v48 = vpop.xlane.xlu0 %641 }
 0x1c1   : > { %v645_v49 = vsub.f32 %v2235_v60, %v642_v48 }
 0x1c3   : > { %v647_v53 = vmul.f32 1.442695, %v645_v49 }
 0x1c4   : > { %v644_v56 = vpop.xlane.xlu0 %643 }
 0x1c5   : > { %1878 = vpow2.f32 %v647_v53  ;;  %v646_v58 = vsub.f32 %v2237_v2, %v644_v56 }
 0x1c7   : > { %v649_v59 = vmul.f32 1.442695, %v646_v58 }
 0x1c9   : > { %1880 = vpow2.f32 %v649_v59 }
 0x1cf   : > { %v1879_v60 = vpop.eup %1878 }
 0x1d0   : > { %v657_v62 = vmul.f32 %v1879_v60, %v655_v61 }
 0x1d2   : > { %659 = vadd.xlane.f32.xlu1 %v657_v62 }
 0x1d3   : > { %v1881_v63 = vpop.eup %1880 }
 0x1d4   : > { %v658_v3 = vmul.f32 %v1881_v63, %v655_v61 }
 0x1d6   : > { %661 = vadd.xlane.f32.xlu1 %v658_v3 }
 0x1e4   : > { %v839_v54 = vpop.trf.xlu0 }
 0x1e5   : > { %v887_v4 = vmul.f32 %v839_v54, %v839_v54 }
 0x1e8   : > { %v840_v57 = vpop.trf.xlu0 }
 0x1e9   : > { %v888_v6 = vmul.f32 %v840_v57, %v840_v57 }
 0x1eb   : > { %v895_v7 = vadd.f32 %v888_v6, %v887_v4 }
 0x1ec   : > { %v841_v2 = vpop.trf.xlu0 }
 0x209   : > { %855 = vxpose.xlu1.b32.start [1/16] (narrow) %v2258_v9, 32  ;;  %v889_v9 = vmul.f32 %v841_v2, %v841_v2 }
 0x20b   : > { %v896_v12 = vadd.f32 %v895_v7, %v889_v9 }
 0x20d   : > { %856 = vxpose.xlu1.b32.cont [2/16] (narrow) %v2261_v10, 32  ;;  %v842_v10 = vpop.trf.xlu0 }
 0x20e   : > { %v890_v13 = vmul.f32 %v842_v10, %v842_v10 }
 0x210   : > { %v897_v16 = vadd.f32 %v896_v12, %v890_v13 }
 0x211   : > { %857 = vxpose.xlu1.b32.cont [3/16] (narrow) %v2298_v25, 32 }
 0x212   : > { %v898_v19 = vrot.slane %v897_v16, 4 }
 0x214   : > { %v899_v21 = vadd.f32 %v898_v19, %v897_v16 }
 0x215   : > { %858 = vxpose.xlu1.b32.cont [4/16] (narrow) %v2302_v27, 32 }
 0x216   : > { %v900_v24 = vrot.slane %v899_v21, 2 }
 0x218   : > { %v901_v30 = vadd.f32 %v900_v24, %v899_v21 }
 0x219   : > { %859 = vxpose.xlu1.b32.cont [5/16] (narrow) %v374_v31, 32 }
 0x21d   : > { %860 = vxpose.xlu1.b32.cont [6/16] (narrow) %v375_v33, 32 }
 0x221   : > { %861 = vxpose.xlu1.b32.cont [7/16] (narrow) %v376_v36, 32  ;;  %v902_v36 = vrot.slane %v901_v30, 1 }
 0x225   : > { %862 = vxpose.xlu1.b32.cont [8/16] (narrow) %v377_v37, 32 }
 0x229   : > { %863 = vxpose.xlu1.b32.cont [9/16] (narrow) %v378_v39, 32  ;;  %v903_v39 = vadd.f32 %v902_v36, %v901_v30 }
 0x22d   : > { %864 = vxpose.xlu1.b32.cont [10/16] (narrow) %v379_v40, 32 }
 0x231   : > { %865 = vxpose.xlu1.b32.cont [11/16] (narrow) %v380_v42, 32 }
 0x235   : > { %866 = vxpose.xlu1.b32.cont [12/16] (narrow) %v381_v43, 32 }
 0x239   : > { %867 = vxpose.xlu1.b32.cont [13/16] (narrow) %v382_v45, 32 }
 0x23d   : > { %868 = vxpose.xlu1.b32.cont [14/16] (narrow) %v383_v46, 32 }
 0x241   : > { %869 = vxpose.xlu1.b32.cont [15/16] (narrow) %v384_v50, 32 }
 0x245   : > { %870 = vxpose.xlu1.b32.end [16/16] (narrow) %v385_v51, 32 }
 0x25f   : > { %v660_v15 = vpop.xlane.xlu1 %659 }
 0x260   : > { %1882 = vrcp.f32 %v660_v15 }
 0x263   : > { %v662_v18 = vpop.xlane.xlu1 %661 }
 0x264   : > { %1884 = vrcp.f32 %v662_v18 }
 0x26a   : > { %v1883_v22 = vpop.eup %1882 }
 0x26b   : > { %v665_v25 = vmul.f32 %v1883_v22, %v657_v62 }
 0x26d   : > { %1555 = vmatmul.mubr.f32.vlgmr.msra.gmra.mrb[2].mxu0 %v665_v25  ;;  %v809_v26 = vmul.f32 %v665_v25, %v665_v25 }
 0x26e   : > { %v1885_v27 = vpop.eup %1884  ;;  %1776 = vmatpush3.bf16.msra.mxu0 %v2250_v5  ;;  %1624 = vmatprep.mubr.msk.f32.mxu0 %vm2015_vm1, %v2016_v1 }
 0x26f   : > { %v811_v31 = vrot.slane %v809_v26, 4  ;;  %v666_v32 = vmul.f32 %v1885_v27, %v658_v3  ;;  %1777 = vmatprep.subr.bf16.mxu0 %v2014_v0 }
 0x271   : > { %v812_v33 = vadd.f32 %v811_v31, %v809_v26  ;;  %1590 = vmatmul.mubr.f32.vlgmr.msra.gmra.mrb[2].mxu1 %v666_v32 }
 0x272   : > { %1800 = vmatpush3.bf16.msra.mxu1 %v2266_v11  ;;  %1779 = vmatpush3.bf16.msra.mxu0 %v2254_v8 }
 0x273   : > { %v813_v37 = vrot.slane %v812_v33, 2  ;;  %1801 = vmatprep.subr.bf16.mxu1 %v2014_v0  ;;  %1780 = vmatprep.subr.bf16.mxu0 %v2014_v0 }
 0x274   : > { %1659 = vmatprep.mubr.msk.f32.mxu1 %vm2015_vm1, %v2016_v1 }
 0x275   : > { %v814_v5 = vadd.f32 %v813_v37, %v812_v33 }
 0x276   : > { %1803 = vmatpush3.bf16.msra.mxu1 %v2308_v29  ;;  %1782 = vmatpush3.bf16.msra.mxu0 %v2270_v14  ;;  %v810_v29 = vmul.f32 %v666_v32, %v666_v32 }
 0x277   : > { %v815_v40 = vrot.slane %v814_v5, 1  ;;  %1804 = vmatprep.subr.bf16.mxu1 %v2014_v0  ;;  %1783 = vmatprep.subr.bf16.mxu0 %v2014_v0 }
 0x278   : > { %v817_v42 = vrot.slane %v810_v29, 4 }
 0x279   : > { %v816_v8 = vadd.f32 %v815_v40, %v814_v5 }
 0x27a   : > { %1806 = vmatpush3.bf16.msra.mxu1 %v2320_v35  ;;  %1785 = vmatpush3.bf16.msra.mxu0 %v2278_v17 }
 0x27b   : > { %v913_v11 = vmul.f32 %v903_v39, %v816_v8  ;;  %1807 = vmatprep.subr.bf16.mxu1 %v2014_v0  ;;  %1786 = vmatprep.subr.bf16.mxu0 %v2014_v0 }
 0x27d   : > { %1886 = vrsqrt.f32 %v913_v11  ;;  %vm917_vm3 = vcmp.eq.f32.partialorder %v913_v11, inf  ;;  %vm919_vm4 = vcmp.eq.f32.partialorder %v913_v11, 0.0 }
 0x27e   : > { %1809 = vmatpush3.bf16.msra.mxu1 %v2328_v38  ;;  %1788 = vmatpush3.bf16.msra.mxu0 %v2284_v20  ;;  %v920_v20 = vand.u32 2147483648, %v913_v11 }
 0x27f   : > { %1810 = vmatprep.subr.bf16.mxu1 %v2014_v0  ;;  %1789 = vmatprep.subr.bf16.mxu0 %v2014_v0 }
 0x282   : > { %1812 = vmatpush3.bf16.msra.mxu1 %v2334_v41  ;;  %1791 = vmatpush3.bf16.msra.mxu0 %v2292_v23 }
 0x283   : > { %1813 = vmatprep.subr.bf16.mxu1 %v2014_v0  ;;  %1792 = vmatprep.subr.bf16.mxu0 %v2014_v0 }
 0x286   : > { %1815 = vmatpush3.bf16.msra.mxu1 %v2340_v44  ;;  %1794 = vmatpush3.bf16.msra.mxu0 %v2304_v28  ;;  %v818_v44 = vadd.f32 %v817_v42, %v810_v29 }
 0x287   : > { %v1887_v1 = vpop.eup %1886  ;;  %1816 = vmatprep.subr.bf16.mxu1 %v2014_v0  ;;  %1795 = vmatprep.subr.bf16.mxu0 %v2014_v0 }
 0x288   : > { %v916_v14 = vmul.f32 %v1887_v1, %v913_v11  ;;  %v819_v48 = vrot.slane %v818_v44, 2 }
 0x289   : > { %v871_v17 = vpop.trf.xlu1 }
 0x28a   : > { %1818 = vmatpush3.bf16.msra.mxu1 %v2346_v47  ;;  %1797 = vmatpush3.bf16.msra.mxu0 %v2318_v34  ;;  %v918_v23 = vsel %vm917_vm3, %v913_v11, %v916_v14  ;;  %v891_v35 = vmul.f32 %v871_v17, %v871_v17  ;;  %v820_v51 = vadd.f32 %v819_v48, %v818_v44 }
 0x28b   : > { %1819 = vmatprep.subr.bf16.mxu1 %v2014_v0  ;;  %v921_v28 = vsel %vm919_vm4, %v920_v20, %v918_v23 }
 0x28c   : > { %929 = vst [vmem:[%s2404_s12] sm:$0x1] %v921_v28 }
 0x28d   : > { %v872_v38 = vpop.trf.xlu1  ;;  %1625 = vmatmul.mubr.f32.vlgmr.msra.gmra.mrb[4].mxu0 %v2229_v55 }
 0x28e   : > { %1821 = vmatpush3.bf16.msra.mxu1 %v2353_v52  ;;  %v892_v41 = vmul.f32 %v872_v38, %v872_v38  ;;  %v821_v52 = vrot.slane %v820_v51, 1 }
 0x290   : > { %v904_v34 = vadd.f32 %v892_v41, %v891_v35 }
 0x291   : > { %1660 = vmatmul.mubr.f32.vlgmr.msra.gmra.mrb[4].mxu1 %v2229_v55  ;;  %v873_v43 = vpop.trf.xlu1  ;;  %v822_v55 = vadd.f32 %v821_v52, %v820_v51 }
 0x292   : > { %v893_v0 = vmul.f32 %v873_v43, %v873_v43 }
 0x294   : > { %v905_v45 = vadd.f32 %v904_v34, %v893_v0 }
 0x295   : > { %v874_v46 = vpop.trf.xlu1 }
 0x296   : > { %v894_v47 = vmul.f32 %v874_v46, %v874_v46 }
 0x298   : > { %v906_v49 = vadd.f32 %v905_v45, %v894_v47 }
 0x29a   : > { %v907_v50 = vrot.slane %v906_v49, 4 }
 0x29c   : > { %v908_v53 = vadd.f32 %v907_v50, %v906_v49 }
 0x29e   : > { %v909_v56 = vrot.slane %v908_v53, 2 }
 0x2a0   : > { %v910_v58 = vadd.f32 %v909_v56, %v908_v53 }
 0x2a2   : > { %v911_v59 = vrot.slane %v910_v58, 1 }
 0x2a4   : > { %v912_v61 = vadd.f32 %v911_v59, %v910_v58 }
 0x2a6   : > { %v914_v60 = vmul.f32 %v912_v61, %v822_v55 }
 0x2a8   : > { %1888 = vrsqrt.f32 %v914_v60  ;;  %vm924_vm5 = vcmp.eq.f32.partialorder %v914_v60, inf  ;;  %v927_v3 = vand.u32 2147483648, %v914_v60  ;;  %vm926_vm6 = vcmp.eq.f32.partialorder %v914_v60, 0.0 }
 0x2b2   : > { %v1889_v62 = vpop.eup %1888 }
 0x2b3   : > { %v923_v63 = vmul.f32 %v1889_v62, %v914_v60 }
 0x2b5   : > { %v925_v54 = vsel %vm924_vm5, %v914_v60, %v923_v63 }
 0x2b6   : > { %v928_v57 = vsel %vm926_vm6, %v927_v3, %v925_v54 }
 0x2b7   : > { %930 = vst [vmem:[%s2404_s12 + $0x1] sm:$0x1] %v928_v57 }
 0x2b8   : > { %1903 = shalt.err (!%p1900_p3)
}
 0x2b9   : > { %s1904_s12 = scalar_lea.hbm %s2421_s18, 32  ;;  %s1908_s17 = scalar_lea.hbm %s2545_s5, 64 }
 0x2ba   : > { %p1905_p4 = scmp.ne.s32.totalorder %s2421_s18, %s1904_s12  ;;  %p1909_p9 = scmp.lt.u32.totalorder %s2421_s18, %s2545_s5 }
 0x2bb   : > { %p1910_p10 = scmp.lt.u32.totalorder %s1908_s17, %s1904_s12  ;;  %p1912_p12 = scmp.lt.u32.totalorder %s1904_s12, %s2421_s18 }
 0x2bc   : > { %p1906_p7 = pnand %p1905_p4, %p2099_p5 }
 0x2bd   : > { %p1911_p11 = por %p1910_p10, %p1909_p9 }
 0x2be   : > { %p1907_p8 = pneg %p1906_p7 }
 0x2bf   : > { %p1913_p13 = por %p1912_p12, %p1911_p11 }
 0x2c1   : > { %p1914_p0 = pnand %p1913_p13, %p1907_p8 }
 0x2c3   : > { %1917 = shalt.err (!%p1914_p0)
}
 0x2c4   : > { %s2548_s20 = smov 16   ;;  %s2549_s11 = smov 1  }
 0x2c5   : > { %1823 = dma.vmem_to_hbm [thread:$0]  (%p2099_p5), %s2412_s13, 32, %s2421_s18, %s2423_s19, %s2548_s20, %s2548_s20, %s2549_s11  }
 0x2c6   : > { %s1290_s14 = sshll.u32 %s2392_s9, 4  ;;  %s1347_s17 = sshll.u32 %s2080_s25, 8 }
 0x2c7   : > { %s289_s12 = scalar_lea.vmem [#allocation2], %s1290_s14  ;;  %s2458_s26 = scalar_lea.hbm %s2544_s4, %s1347_s17 }
 0x2c8   : > { %s1098_s16 = sshll.u32 %s289_s12, 4  ;;  %s1075_s13 = scalar_lea.sflag [#allocation3], %s2392_s9  ;;  %s2453_s16 = int_to_ptr.vmem [resolvable:$true] %s1098_s16 }
 0x2c9   : > { %s1918_s18 = scalar_lea.vmem %s2453_s16, 256  ;;  %s2020_s14 = smov [#allocation2]  }
 0x2ca   : > { %p1919_p1 = scmp.ne.s32.totalorder %s2453_s16, %s1918_s18  ;;  %s1922_s20 = sshll.u32 %s2020_s14, 4  ;;  %s1923_s20 = int_to_ptr.vmem [resolvable:$false] %s1922_s20 }
 0x2cb   : > { %s1924_s11 = scalar_lea.vmem %s1923_s20, 512  ;;  %p1925_p4 = scmp.lt.s32.totalorder %s2453_s16, %s1923_s20 }
 0x2cc   : > { %p1920_p2 = pnand %p1919_p1, %p2099_p5  ;;  %p1926_p7 = scmp.lt.s32.totalorder %s1924_s11, %s1918_s18 }
 0x2ce   : > { %p1921_p3 = pneg %p1920_p2  ;;  %p1927_p8 = por %p1926_p7, %p1925_p4 }
 0x2d0   : > { %p1928_p9 = pnand %p1927_p8, %p1921_p3 }
 0x340   : > { %v733_v2 = vpop.f32.mrb[2].mxu0 }
 0x341   : > { %807 = vst.msk [vmem:[%s289_s12] sm:$0xff] %vm389_vm0, %v733_v2  ;;  %v1556_v4 = vpop.f32.mrb[3].mxu0 }
 0x344   : > { %v803_v6 = vpop.f32.mrb[2].mxu1 }
 0x345   : > { %808 = vst.msk [vmem:[%s289_s12 + $0x8] sm:$0xff] %vm389_vm0, %v803_v6  ;;  %v1591_v7 = vpop.f32.mrb[3].mxu1 }
 0x346   : > { %1931 = shalt.err (!%p1928_p9)
}
 0x347   : > { %s1932_s12 = scalar_lea.hbm %s2458_s26, 256  ;;  %s1936_s29 = scalar_lea.hbm %s2544_s4, 512 }
 0x348   : > { %p1933_p10 = scmp.ne.s32.totalorder %s2458_s26, %s1932_s12  ;;  %p1937_p13 = scmp.lt.u32.totalorder %s2458_s26, %s2544_s4 }
 0x349   : > { %p1938_p0 = scmp.lt.u32.totalorder %s1936_s29, %s1932_s12  ;;  %p1940_p2 = scmp.lt.u32.totalorder %s1932_s12, %s2458_s26 }
 0x34a   : > { %p1934_p11 = pnand %p1933_p10, %p2099_p5 }
 0x34b   : > { %p1939_p1 = por %p1938_p0, %p1937_p13 }
 0x34c   : > { %p1935_p12 = pneg %p1934_p11 }
 0x34d   : > { %p1941_p3 = por %p1940_p2, %p1939_p1 }
 0x34f   : > { %p1942_p4 = pnand %p1941_p3, %p1935_p12 }
 0x351   : > { %1945 = shalt.err (!%p1942_p4)
}
 0x352   : > { %s2021_s11 = smov 128   ;;  %s2022_s18 = smov 8   ;;  %vm1071_vm7 = vcmask 253952  }
 0x353   : > { %1822 = dma.vmem_to_hbm [thread:$0]  (%p2099_p5), %s2453_s16, 256, %s2458_s26, %s1075_s13, %s2021_s11, %s2021_s11, %s2022_s18  }
 0x354   : > { %s303_s17 = scalar_lea.vmem [#allocation6], %s1291_s10  ;;  %s2494_s14 = scalar_lea.hbm %s2546_s6, %s1348_s15 }
 0x355   : > { %s1130_s12 = sshll.u32 %s303_s17, 4  ;;  %s2023_s9 = smov [#allocation6]   ;;  %s2487_s12 = int_to_ptr.vmem [resolvable:$true] %s1130_s12 }
 0x356   : > { %s1946_s26 = scalar_lea.vmem %s2487_s12, 32  ;;  %s1950_s10 = sshll.u32 %s2023_s9, 4  ;;  %s1951_s10 = int_to_ptr.vmem [resolvable:$false] %s1950_s10 }
 0x357   : > { %p1947_p7 = scmp.ne.s32.totalorder %s2487_s12, %s1946_s26  ;;  %s1952_s25 = scalar_lea.vmem %s1951_s10, 64 }
 0x358   : > { %p1953_p10 = scmp.lt.s32.totalorder %s2487_s12, %s1951_s10  ;;  %p1954_p11 = scmp.lt.s32.totalorder %s1952_s25, %s1946_s26 }
 0x359   : > { %p1948_p8 = pnand %p1947_p7, %p2099_p5 }
 0x35a   : > { %p1955_p12 = por %p1954_p11, %p1953_p10 }
 0x35b   : > { %p1949_p9 = pneg %p1948_p8 }
 0x35d   : > { %p1956_p13 = pnand %p1955_p12, %p1949_p9 }
 0x360   : > { %v997_v9 = vpop.f32.mrb[4].mxu0 }
 0x361   : > { %1072 = vst.msk [vmem:[%s303_s17] sm:$0x1] %vm1071_vm7, %v997_v9  ;;  %v1626_v10 = vpop.f32.mrb[5].mxu0 }
 0x364   : > { %v1067_v12 = vpop.f32.mrb[4].mxu1 }
 0x365   : > { %1073 = vst.msk [vmem:[%s303_s17 + $0x1] sm:$0x1] %vm1071_vm7, %v1067_v12  ;;  %v1661_v13 = vpop.f32.mrb[5].mxu1 }
 0x366   : > { %1959 = shalt.err (!%p1956_p13)
}
 0x367   : > { %s1960_s15 = scalar_lea.hbm %s2494_s14, 32  ;;  %s1964_s20 = scalar_lea.hbm %s2546_s6, 64 }
 0x368   : > { %p1961_p0 = scmp.ne.s32.totalorder %s2494_s14, %s1960_s15  ;;  %p1965_p3 = scmp.lt.u32.totalorder %s2494_s14, %s2546_s6 }
 0x369   : > { %p1966_p4 = scmp.lt.u32.totalorder %s1964_s20, %s1960_s15  ;;  %p1968_p8 = scmp.lt.u32.totalorder %s1960_s15, %s2494_s14 }
 0x36a   : > { %p1962_p1 = pnand %p1961_p0, %p2099_p5 }
 0x36b   : > { %p1967_p7 = por %p1966_p4, %p1965_p3 }
 0x36c   : > { %p1963_p2 = pneg %p1962_p1 }
 0x36d   : > { %p1969_p9 = por %p1968_p8, %p1967_p7 }
 0x36f   : > { %p1970_p10 = pnand %p1969_p9, %p1963_p2 }
 0x371   : > { %1973 = shalt.err (!%p1970_p10)
}
 0x372   : > { %s2554_s17 = smov 1   ;;  %s2555_s28 = smov 16  }
 0x373   : > { %1824 = dma.vmem_to_hbm [thread:$0]  (%p2099_p5), %s2487_s12, 32, %s2494_s14, %s2423_s19, %s2555_s28, %s2555_s28, %s2554_s17  }
 0x374 PF: > { %p1838_p11 = scmp.ge.s32.totalorder %s2012_s24, 2  ;;  %s1145_s29 = sand.u32 1, %s2000_s21  }
 0x375   : > { %s1146_s26 = scalar_lea.sflag [#allocation3], %s1145_s29 }
 0x376   : > { %p1829_p12 = pnand %p1838_p11, %p2103_p6 }
 0x378   : > { %1991 = dma.done.wait (!%p1829_p12), %s1146_s26, 256  }
 0x379   : > { %1993 = vsyncadd (!%p1829_p12), %s1146_s26, 4294967040  ;;  %s2556_s7 = sadd.s32 4294967294, %s2012_s24  }
 0x37a   : > { %s1154_s9 = sand.u32 1, %s2556_s7  }
 0x37b   : > { %s1155_s10 = scalar_lea.sflag [#allocation5], %s1154_s9 }
 0x37c   : > { %1995 = dma.done.wait (!%p1829_p12), %s1155_s10, 64  }
 0x37d   : > { %1997 = vsyncadd (!%p1829_p12), %s1155_s10, 4294967232  ;;  %p20_p5 = scmp.ge.s32.totalorder %s2084_s27, 4   ;;  %s2557_s21 = smov %s2004_s22 }
 0x37e   : > { %s2558_s22 = smov %s2008_s23  ;;  %s2559_s23 = smov %s2097_s30 }
 0x37f   : > { %s2560_s24 = smov %s2084_s27  ;;  %22 = sbr.rel (!%p20_p5) target bundleno = 5 (0x5), region = 112 }
 0x386   :  { %1169 = vsyncpa [#allocation3], 1 }
 0x387   :  { %1171 = vsyncpa [#allocation3 + $0x1], 1 }
 0x388   :  { %1172 = vsyncpa [#allocation5], 1 }
 0x389   :  { %1174 = vsyncpa [#allocation5 + $0x1], 1 }

</bundles_post_ra>
